<compile_context>
chip_gen: v5e
topology: v5e:2x2
jax: 0.10.0
libtpu: 0.0.40
codegen_flags: <defaults>
</compile_context>

<pallas_src>
import functools

import jax
import jax.numpy as jnp
from jax.experimental import pallas as pl
from jax.experimental.pallas import tpu as pltpu


def _round_up(x, m):
    return ((x + m - 1) // m) * m


def gmmle_kernel(
    num_components,
    state_ref,
    w1_ref, b1_ref,
    w2_ref, b2_ref,
    w3_ref, b3_ref,
    w4_ref, b4_ref,
    wh_ref, bh_ref,          # fused [mixture_weights | mu | log_sigma] head (lane-padded)
    out_ref,                 # fused (TILE_B, head_pad) output slab
):
    wdt = w1_ref.dtype       # bf16 (default throughput mode) or f32 (exact mode)

    def dense_relu(x, w_ref, b_ref):
        y = jnp.dot(x.astype(wdt), w_ref[...],
                    preferred_element_type=jnp.float32) + b_ref[...]
        return jnp.maximum(y, 0.0)

    # fc: Linear+ReLU x4  (state_dim -> 128 -> 128 -> 64 -> 32)
    h = dense_relu(state_ref[...], w1_ref, b1_ref)
    h = dense_relu(h, w2_ref, b2_ref)
    h = dense_relu(h, w3_ref, b3_ref)
    h = dense_relu(h, w4_ref, b4_ref)

    # Single fused head matmul: columns = [logits(K) | mu(K*A) | log_sigma(K*A) | 0-pad]
    heads = jnp.dot(h.astype(wdt), wh_ref[...],
                    preferred_element_type=jnp.float32) + bh_ref[...]

    # Masked, whole-vreg softmax over the first K lanes (no lane-offset slices).
    lane = jax.lax.broadcasted_iota(jnp.int32, heads.shape, dimension=1)
    is_logit = lane < num_components
    neg_inf = jnp.float32(-jnp.inf)

    masked_logits = jnp.where(is_logit, heads, neg_inf)
    m = jnp.max(masked_logits, axis=-1, keepdims=True)           # finite (K >= 1)
    shifted = jnp.where(is_logit, heads - m, neg_inf)            # masked lanes -> -inf
    e = jnp.exp(shifted)                                         # masked lanes -> 0
    denom = jnp.sum(e, axis=-1, keepdims=True)
    alpha = e / denom                                            # EXACT division

    # One lane-dense, in-place store of the whole slab.
    out_ref[...] = jnp.where(is_logit, alpha, heads).astype(out_ref.dtype)


def init_params(key, state_dim, action_dim, num_components):
    """Deterministic PyTorch-style init (uniform +- 1/sqrt(fan_in)).

    Weights are stored transposed: (in_dim, out_dim); biases as (1, out_dim)."""
    dims = [
        (state_dim, 128),
        (128, 128),
        (128, 64),
        (64, 32),
        (32, num_components),                 # mixture_weights_head
        (32, num_components * action_dim),    # mu_head
        (32, num_components * action_dim),    # log_sigma_head
    ]
    params = []
    for (fan_in, fan_out) in dims:
        key, kw, kb = jax.random.split(key, 3)
        bound = 1.0 / jnp.sqrt(jnp.float32(fan_in))
        w = jax.random.uniform(kw, (fan_in, fan_out), jnp.float32, -bound, bound)
        b = jax.random.uniform(kb, (1, fan_out), jnp.float32, -bound, bound)
        params.append((w, b))
    return params


def _pack_params(params, param_dtype):
    """Fuse the three heads into one lane-padded matrix; flatten all params."""
    (w1, b1), (w2, b2), (w3, b3), (w4, b4), (wa, ba), (wm, bm), (ws, bs) = params
    wh = jnp.concatenate([wa, wm, ws], axis=1)       # (32, K + 2*K*A)
    bh = jnp.concatenate([ba, bm, bs], axis=1)       # (1,  K + 2*K*A)
    head_out = wh.shape[1]
    pad = (-head_out) % 128                          # pad fused head to lane-dense width
    if pad:
        wh = jnp.pad(wh, ((0, 0), (0, pad)))
        bh = jnp.pad(bh, ((0, 0), (0, pad)))
    weights = [w.astype(param_dtype) for w in (w1, w2, w3, w4, wh)]
    biases = [b.astype(jnp.float32) for b in (b1, b2, b3, b4, bh)]  # f32 accumulate
    flat = []
    for w, b in zip(weights, biases):
        flat.extend([w, b])
    return flat, head_out + pad


def gmmle_forward(state, params, num_components, action_dim, *,
                  param_dtype=jnp.bfloat16,     # bf16 MXU inputs by default
                  out_dtype=jnp.float32,        # set bf16 if writeback-bound (v5e, big B)
                  tile_cap=512):
    B, state_dim = state.shape
    KA = num_components * action_dim
    head_out = num_components + 2 * KA

    flat_params, head_pad = _pack_params(params, param_dtype)

    # Balanced batch tiles, rounded to sublane multiples (8), capped so v7x's
    # two TensorCores always see >=2 "parallel" grid steps for mid/large B.
    # VMEM footprint per step is ~1 MB at TILE_B=512 -> far under every
    # generation's scoped limit.
    num_tiles = pl.cdiv(B, tile_cap)
    if B > 16:                       # only split when each half is >= 1 sublane group
        num_tiles = max(2, num_tiles)
    num_tiles = max(1, num_tiles)
    TILE_B = _round_up(pl.cdiv(B, num_tiles), 8)
    if TILE_B >= B:
        TILE_B = B                   # block == full array -> always layout-legal
    grid = (pl.cdiv(B, TILE_B),)

    def const_spec(p):
        # Full-array block, constant index_map -> stays resident in VMEM.
        return pl.BlockSpec(p.shape, lambda i: (0, 0))

    in_specs = [pl.BlockSpec((TILE_B, state_dim), lambda i: (i, 0))]
    in_specs += [const_spec(p) for p in flat_params]
    out_specs = pl.BlockSpec((TILE_B, head_pad), lambda i: (i, 0))

    out = pl.pallas_call(
        functools.partial(gmmle_kernel, num_components),
        grid=grid,
        out_shape=jax.ShapeDtypeStruct((B, head_pad), out_dtype),
        in_specs=in_specs,
        out_specs=out_specs,
        compiler_params=pltpu.CompilerParams(
            dimension_semantics=("parallel",)),   # shards batch across v7x's 2 TCs
    )(state, *flat_params)

    alpha = out[:, :num_components]
    mu = out[:, num_components:num_components + KA].reshape(
        B, num_components, action_dim)
    log_sigma = out[:, num_components + KA:head_out].reshape(
        B, num_components, action_dim)
    return alpha, mu, log_sigma


def gmmle_reference(state, params, num_components, action_dim):
    """Pure-JAX f32 reference mirroring the PyTorch module."""
    x = state
    for (w, b) in params[:4]:
        x = jnp.maximum(x @ w + b, 0.0)
    (wa, ba), (wm, bm), (ws, bs) = params[4], params[5], params[6]
    alpha = jax.nn.softmax(x @ wa + ba, axis=-1)
    B = state.shape[0]
    mu = (x @ wm + bm).reshape(B, num_components, action_dim)
    log_sigma = (x @ ws + bs).reshape(B, num_components, action_dim)
    return alpha, mu, log_sigma


if __name__ == "__main__":
    state_dim = 16
    action_dim = 4
    num_components = 5
    batch = 8

    key = jax.random.PRNGKey(0)
    key, ks = jax.random.split(key)
    state = jax.random.normal(ks, (batch, state_dim), dtype=jnp.float32)

    params = init_params(key, state_dim, action_dim, num_components)
    a_ref, mu_r, ls_r = gmmle_reference(state, params, num_components, action_dim)

    # --- exact-f32 mode: tight parity with the PyTorch-equivalent reference ---
    a32, mu32, ls32 = gmmle_forward(state, params, num_components, action_dim,
                                    param_dtype=jnp.float32)
    jax.block_until_ready((a32, mu32, ls32))

    assert a32.shape == (batch, num_components)
    assert mu32.shape == (batch, num_components, action_dim)
    assert ls32.shape == (batch, num_components, action_dim)
    assert bool(jnp.allclose(jnp.sum(a32, axis=-1), 1.0, atol=1e-5))
    assert bool(jnp.allclose(a32, a_ref, atol=1e-4, rtol=1e-4))
    assert bool(jnp.allclose(mu32, mu_r, atol=1e-4, rtol=1e-4))
    assert bool(jnp.allclose(ls32, ls_r, atol=1e-4, rtol=1e-4))

    # --- default bf16-weight throughput mode: looser (bf16-level) tolerance ---
    alpha, mu, log_sigma = gmmle_forward(state, params, num_components, action_dim)
    jax.block_until_ready((alpha, mu, log_sigma))

    assert bool(jnp.allclose(jnp.sum(alpha, axis=-1), 1.0, atol=1e-5))
    assert bool(jnp.allclose(alpha, a_ref, atol=5e-2, rtol=5e-2))
    assert bool(jnp.allclose(mu, mu_r, atol=5e-2, rtol=5e-2))
    assert bool(jnp.allclose(log_sigma, ls_r, atol=5e-2, rtol=5e-2))

    print("KERNEL_OK")
</pallas_src>

<mosaic_0001>
module attributes {stable_mosaic.version = 11 : i64} {
  func.func @gmmle_kernel(%arg0: i32, %arg1: memref<8x16xf32, #tpu.memory_space<vmem>>, %arg2: memref<16x128xf32, #tpu.memory_space<vmem>>, %arg3: memref<1x128xf32, #tpu.memory_space<vmem>>, %arg4: memref<128x128xf32, #tpu.memory_space<vmem>>, %arg5: memref<1x128xf32, #tpu.memory_space<vmem>>, %arg6: memref<128x64xf32, #tpu.memory_space<vmem>>, %arg7: memref<1x64xf32, #tpu.memory_space<vmem>>, %arg8: memref<64x32xf32, #tpu.memory_space<vmem>>, %arg9: memref<1x32xf32, #tpu.memory_space<vmem>>, %arg10: memref<32x128xf32, #tpu.memory_space<vmem>>, %arg11: memref<1x128xf32, #tpu.memory_space<vmem>>, %arg12: memref<8x128xf32, #tpu.memory_space<vmem>>) attributes {dimension_semantics = [#tpu.dimension_semantics<parallel>], iteration_bounds = array<i64: 1>, scalar_prefetch = 0 : i64, scratch_operands = 0 : i64, tpu.core_type = #tpu.core_type<tc>, window_params = [{transform_indices = @transform_0, window_bounds = array<i64: 8, 16>}, {pipeline_mode = #tpu.pipeline_mode<synchronous>, transform_indices = @transform_1, window_bounds = array<i64: 16, 128>}, {pipeline_mode = #tpu.pipeline_mode<synchronous>, transform_indices = @transform_2, window_bounds = array<i64: 1, 128>}, {pipeline_mode = #tpu.pipeline_mode<synchronous>, transform_indices = @transform_3, window_bounds = array<i64: 128, 128>}, {pipeline_mode = #tpu.pipeline_mode<synchronous>, transform_indices = @transform_4, window_bounds = array<i64: 1, 128>}, {pipeline_mode = #tpu.pipeline_mode<synchronous>, transform_indices = @transform_5, window_bounds = array<i64: 128, 64>}, {pipeline_mode = #tpu.pipeline_mode<synchronous>, transform_indices = @transform_6, window_bounds = array<i64: 1, 64>}, {pipeline_mode = #tpu.pipeline_mode<synchronous>, transform_indices = @transform_7, window_bounds = array<i64: 64, 32>}, {pipeline_mode = #tpu.pipeline_mode<synchronous>, transform_indices = @transform_8, window_bounds = array<i64: 1, 32>}, {pipeline_mode = #tpu.pipeline_mode<synchronous>, transform_indices = @transform_9, window_bounds = array<i64: 32, 128>}, {pipeline_mode = #tpu.pipeline_mode<synchronous>, transform_indices = @transform_10, window_bounds = array<i64: 1, 128>}, {transform_indices = @transform_11, window_bounds = array<i64: 8, 128>}]} {
    %c0 = arith.constant 0 : index
    %c0_0 = arith.constant 0 : index
    %0 = vector.load %arg1[%c0, %c0_0] : memref<8x16xf32, #tpu.memory_space<vmem>>, vector<8x16xf32>
    %c0_1 = arith.constant 0 : index
    %c0_2 = arith.constant 0 : index
    %1 = vector.load %arg2[%c0_1, %c0_2] : memref<16x128xf32, #tpu.memory_space<vmem>>, vector<16x128xf32>
    %cst = arith.constant dense<0.000000e+00> : vector<8x128xf32>
    %2 = tpu.matmul %0, %1, %cst {dimension_numbers = #tpu.dot_dimension_numbers<[1], [0], [0], [1], [0, 0, 1, 1], [], []>} : vector<8x16xf32>, vector<16x128xf32>, vector<8x128xf32> -> vector<8x128xf32>
    %c0_3 = arith.constant 0 : index
    %c0_4 = arith.constant 0 : index
    %3 = vector.load %arg3[%c0_3, %c0_4] : memref<1x128xf32, #tpu.memory_space<vmem>>, vector<1x128xf32>
    %4 = vector.broadcast %3 : vector<1x128xf32> to vector<8x128xf32>
    %5 = arith.addf %2, %4 : vector<8x128xf32>
    %cst_5 = arith.constant 0.000000e+00 : f32
    %6 = vector.broadcast %cst_5 : f32 to vector<8x128xf32>
    %7 = arith.maximumf %5, %6 : vector<8x128xf32>
    %c0_6 = arith.constant 0 : index
    %c0_7 = arith.constant 0 : index
    %8 = vector.load %arg4[%c0_6, %c0_7] : memref<128x128xf32, #tpu.memory_space<vmem>>, vector<128x128xf32>
    %cst_8 = arith.constant dense<0.000000e+00> : vector<8x128xf32>
    %9 = tpu.matmul %7, %8, %cst_8 {dimension_numbers = #tpu.dot_dimension_numbers<[1], [0], [0], [1], [0, 0, 1, 1], [], []>} : vector<8x128xf32>, vector<128x128xf32>, vector<8x128xf32> -> vector<8x128xf32>
    %c0_9 = arith.constant 0 : index
    %c0_10 = arith.constant 0 : index
    %10 = vector.load %arg5[%c0_9, %c0_10] : memref<1x128xf32, #tpu.memory_space<vmem>>, vector<1x128xf32>
    %11 = vector.broadcast %10 : vector<1x128xf32> to vector<8x128xf32>
    %12 = arith.addf %9, %11 : vector<8x128xf32>
    %cst_11 = arith.constant 0.000000e+00 : f32
    %13 = vector.broadcast %cst_11 : f32 to vector<8x128xf32>
    %14 = arith.maximumf %12, %13 : vector<8x128xf32>
    %c0_12 = arith.constant 0 : index
    %c0_13 = arith.constant 0 : index
    %15 = vector.load %arg6[%c0_12, %c0_13] : memref<128x64xf32, #tpu.memory_space<vmem>>, vector<128x64xf32>
    %cst_14 = arith.constant dense<0.000000e+00> : vector<8x64xf32>
    %16 = tpu.matmul %14, %15, %cst_14 {dimension_numbers = #tpu.dot_dimension_numbers<[1], [0], [0], [1], [0, 0, 1, 1], [], []>} : vector<8x128xf32>, vector<128x64xf32>, vector<8x64xf32> -> vector<8x64xf32>
    %c0_15 = arith.constant 0 : index
    %c0_16 = arith.constant 0 : index
    %17 = vector.load %arg7[%c0_15, %c0_16] : memref<1x64xf32, #tpu.memory_space<vmem>>, vector<1x64xf32>
    %18 = vector.broadcast %17 : vector<1x64xf32> to vector<8x64xf32>
    %19 = arith.addf %16, %18 : vector<8x64xf32>
    %cst_17 = arith.constant 0.000000e+00 : f32
    %20 = vector.broadcast %cst_17 : f32 to vector<8x64xf32>
    %21 = arith.maximumf %19, %20 : vector<8x64xf32>
    %c0_18 = arith.constant 0 : index
    %c0_19 = arith.constant 0 : index
    %22 = vector.load %arg8[%c0_18, %c0_19] : memref<64x32xf32, #tpu.memory_space<vmem>>, vector<64x32xf32>
    %cst_20 = arith.constant dense<0.000000e+00> : vector<8x32xf32>
    %23 = tpu.matmul %21, %22, %cst_20 {dimension_numbers = #tpu.dot_dimension_numbers<[1], [0], [0], [1], [0, 0, 1, 1], [], []>} : vector<8x64xf32>, vector<64x32xf32>, vector<8x32xf32> -> vector<8x32xf32>
    %c0_21 = arith.constant 0 : index
    %c0_22 = arith.constant 0 : index
    %24 = vector.load %arg9[%c0_21, %c0_22] : memref<1x32xf32, #tpu.memory_space<vmem>>, vector<1x32xf32>
    %25 = vector.broadcast %24 : vector<1x32xf32> to vector<8x32xf32>
    %26 = arith.addf %23, %25 : vector<8x32xf32>
    %cst_23 = arith.constant 0.000000e+00 : f32
    %27 = vector.broadcast %cst_23 : f32 to vector<8x32xf32>
    %28 = arith.maximumf %26, %27 : vector<8x32xf32>
    %c0_24 = arith.constant 0 : index
    %c0_25 = arith.constant 0 : index
    %29 = vector.load %arg10[%c0_24, %c0_25] : memref<32x128xf32, #tpu.memory_space<vmem>>, vector<32x128xf32>
    %cst_26 = arith.constant dense<0.000000e+00> : vector<8x128xf32>
    %30 = tpu.matmul %28, %29, %cst_26 {dimension_numbers = #tpu.dot_dimension_numbers<[1], [0], [0], [1], [0, 0, 1, 1], [], []>} : vector<8x32xf32>, vector<32x128xf32>, vector<8x128xf32> -> vector<8x128xf32>
    %c0_27 = arith.constant 0 : index
    %c0_28 = arith.constant 0 : index
    %31 = vector.load %arg11[%c0_27, %c0_28] : memref<1x128xf32, #tpu.memory_space<vmem>>, vector<1x128xf32>
    %32 = vector.broadcast %31 : vector<1x128xf32> to vector<8x128xf32>
    %33 = arith.addf %30, %32 : vector<8x128xf32>
    %34 = tpu.iota {dimensions = array<i32: 1>} : vector<8x128xi32>
    %c5_i32 = arith.constant 5 : i32
    %35 = vector.broadcast %c5_i32 : i32 to vector<8x128xi32>
    %36 = arith.cmpi slt, %34, %35 : vector<8x128xi32>
    %cst_29 = arith.constant 0xFF800000 : f32
    %37 = vector.broadcast %cst_29 : f32 to vector<8x128xf32>
    %38 = arith.select %36, %33, %37 : vector<8x128xi1>, vector<8x128xf32>
    %cst_30 = arith.constant dense<0xFF800000> : vector<8xf32>
    %39 = vector.multi_reduction <maximumf>, %38, %cst_30 [1] : vector<8x128xf32> to vector<8xf32>
    %40 = vector.shape_cast %39 : vector<8xf32> to vector<8x1xf32>
    %41 = vector.broadcast %40 : vector<8x1xf32> to vector<8x128xf32>
    %42 = arith.subf %33, %41 : vector<8x128xf32>
    %cst_31 = arith.constant 0xFF800000 : f32
    %43 = vector.broadcast %cst_31 : f32 to vector<8x128xf32>
    %44 = arith.select %36, %42, %43 : vector<8x128xi1>, vector<8x128xf32>
    %45 = math.exp %44 : vector<8x128xf32>
    %cst_32 = arith.constant dense<0.000000e+00> : vector<8xf32>
    %46 = vector.multi_reduction <add>, %45, %cst_32 [1] : vector<8x128xf32> to vector<8xf32>
    %47 = vector.shape_cast %46 : vector<8xf32> to vector<8x1xf32>
    %48 = vector.broadcast %47 : vector<8x1xf32> to vector<8x128xf32>
    %49 = arith.divf %45, %48 : vector<8x128xf32>
    %50 = arith.select %36, %49, %33 : vector<8x128xi1>, vector<8x128xf32>
    %c0_33 = arith.constant 0 : index
    %c0_34 = arith.constant 0 : index
    %51 = vector.load %arg12[%c0_33, %c0_34] : memref<8x128xf32, #tpu.memory_space<vmem>>, vector<8x128xf32>
    tpu.vector_store %arg12[%c0_33, %c0_34], %50 {strides = array<i32>} : memref<8x128xf32, #tpu.memory_space<vmem>>, vector<8x128xf32>,
    return
  }
  func.func @transform_0(%arg0: i32) -> (i32, i32) {
    %c0_i32 = arith.constant 0 : i32
    %c0_i32_0 = arith.constant 0 : i32
    return %arg0, %c0_i32 : i32, i32
  }
  func.func @transform_1(%arg0: i32) -> (i32, i32) {
    %c0_i32 = arith.constant 0 : i32
    %c0_i32_0 = arith.constant 0 : i32
    %c0_i32_1 = arith.constant 0 : i32
    return %c0_i32, %c0_i32_0 : i32, i32
  }
  func.func @transform_2(%arg0: i32) -> (i32, i32) {
    %c0_i32 = arith.constant 0 : i32
    %c0_i32_0 = arith.constant 0 : i32
    %c0_i32_1 = arith.constant 0 : i32
    return %c0_i32, %c0_i32_0 : i32, i32
  }
  func.func @transform_3(%arg0: i32) -> (i32, i32) {
    %c0_i32 = arith.constant 0 : i32
    %c0_i32_0 = arith.constant 0 : i32
    %c0_i32_1 = arith.constant 0 : i32
    return %c0_i32, %c0_i32_0 : i32, i32
  }
  func.func @transform_4(%arg0: i32) -> (i32, i32) {
    %c0_i32 = arith.constant 0 : i32
    %c0_i32_0 = arith.constant 0 : i32
    %c0_i32_1 = arith.constant 0 : i32
    return %c0_i32, %c0_i32_0 : i32, i32
  }
  func.func @transform_5(%arg0: i32) -> (i32, i32) {
    %c0_i32 = arith.constant 0 : i32
    %c0_i32_0 = arith.constant 0 : i32
    %c0_i32_1 = arith.constant 0 : i32
    return %c0_i32, %c0_i32_0 : i32, i32
  }
  func.func @transform_6(%arg0: i32) -> (i32, i32) {
    %c0_i32 = arith.constant 0 : i32
    %c0_i32_0 = arith.constant 0 : i32
    %c0_i32_1 = arith.constant 0 : i32
    return %c0_i32, %c0_i32_0 : i32, i32
  }
  func.func @transform_7(%arg0: i32) -> (i32, i32) {
    %c0_i32 = arith.constant 0 : i32
    %c0_i32_0 = arith.constant 0 : i32
    %c0_i32_1 = arith.constant 0 : i32
    return %c0_i32, %c0_i32_0 : i32, i32
  }
  func.func @transform_8(%arg0: i32) -> (i32, i32) {
    %c0_i32 = arith.constant 0 : i32
    %c0_i32_0 = arith.constant 0 : i32
    %c0_i32_1 = arith.constant 0 : i32
    return %c0_i32, %c0_i32_0 : i32, i32
  }
  func.func @transform_9(%arg0: i32) -> (i32, i32) {
    %c0_i32 = arith.constant 0 : i32
    %c0_i32_0 = arith.constant 0 : i32
    %c0_i32_1 = arith.constant 0 : i32
    return %c0_i32, %c0_i32_0 : i32, i32
  }
  func.func @transform_10(%arg0: i32) -> (i32, i32) {
    %c0_i32 = arith.constant 0 : i32
    %c0_i32_0 = arith.constant 0 : i32
    %c0_i32_1 = arith.constant 0 : i32
    return %c0_i32, %c0_i32_0 : i32, i32
  }
  func.func @transform_11(%arg0: i32) -> (i32, i32) {
    %c0_i32 = arith.constant 0 : i32
    %c0_i32_0 = arith.constant 0 : i32
    return %arg0, %c0_i32 : i32, i32
  }
}

</mosaic_0001>

<bundles_post_ra>
// kernel: tpu_custom_call.1
= control target key start
LH: loop header
LB: loop body
LE: loop exit
PB: predicated region body
PF: predicated region fallthrough
CT: control target
= control target key end

     0   :  { %vm46_vm0 = vcmask 130048   ;;  %s529_s0 = inlined_call_operand.vmem [shape: f32[8,16], index: 0, kind: input, shape index: {}]   ;;  %s530_s1 = inlined_call_operand.vmem [shape: f32[16,128], index: 1, kind: input, shape index: {}]   ;;  %s531_s2 = inlined_call_operand.vmem [shape: f32[1,128], index: 2, kind: input, shape index: {}]   ;;  %s532_s3 = inlined_call_operand.vmem [shape: f32[128,128], index: 3, kind: input, shape index: {}]   ;;  %s533_s4 = inlined_call_operand.vmem [shape: f32[1,128], index: 4, kind: input, shape index: {}]   ;;  %s534_s5 = inlined_call_operand.vmem [shape: f32[128,64], index: 5, kind: input, shape index: {}]   ;;  %s535_s6 = inlined_call_operand.vmem [shape: f32[1,64], index: 6, kind: input, shape index: {}]   ;;  %s536_s7 = inlined_call_operand.vmem [shape: f32[64,32], index: 7, kind: input, shape index: {}]   ;;  %s537_s8 = inlined_call_operand.vmem [shape: f32[1,32], index: 8, kind: input, shape index: {}]   ;;  %s538_s9 = inlined_call_operand.vmem [shape: f32[32,128], index: 9, kind: input, shape index: {}]   ;;  %s539_s10 = inlined_call_operand.vmem [shape: f32[1,128], index: 10, kind: input, shape index: {}]   ;;  %s540_s11 = inlined_call_operand.hbm [shape: f32[8,128], index: 11, kind: output, shape index: {}]  }
   0x1   :  { %v41_v0 = vld [vmem:[%s530_s1 + $0x8] sm:$0xff]  ;;  %v40_v1 = vld [vmem:[%s530_s1] sm:$0xff]  ;;  %v86_v3 = vld [vmem:[%s532_s3 + $0x78] sm:$0xff] }
   0x2   :  { %64 = vmatpush.msra.mxu0 %v41_v0  ;;  %v39_v2 = vld [vmem:[%s529_s0] sm:$0xff]  ;;  %v85_v4 = vld [vmem:[%s532_s3 + $0x70] sm:$0xff]  ;;  %91 = vmatpush.msra.mxu1 %v86_v3  ;;  %v84_v5 = vld [vmem:[%s532_s3 + $0x68] sm:$0xff] }
   0x3   :  { %v83_v6 = vld [vmem:[%s532_s3 + $0x60] sm:$0xff]  ;;  %v82_v7 = vld [vmem:[%s532_s3 + $0x58] sm:$0xff] }
   0x4   :  { %65 = vmatpush.msra.mxu0 %v40_v1  ;;  %92 = vmatpush.msra.mxu1 %v85_v4 }
   0x5   :  { %267 = vmatmul.msk.f32.vlgmr.msra.gmra.mxu0 %vm46_vm0, %v39_v2 }
   0x6   :  { %93 = vmatpush.msra.mxu1 %v84_v5 }
   0x7   :  { %16 = vsyncpa [#allocation3], 0  ;;  %v81_v8 = vld [vmem:[%s532_s3 + $0x50] sm:$0xff]  ;;  %v80_v9 = vld [vmem:[%s532_s3 + $0x48] sm:$0xff]  ;;  %vm165_vm1 = vcmask 523264   ;;  %vm198_vm2 = vcmask 261120   ;;  %v222_v63 = vlaneseq }
   0x8   :  { %94 = vmatpush.msra.mxu1 %v83_v6  ;;  %v79_v10 = vld [vmem:[%s532_s3 + $0x40] sm:$0xff]  ;;  %v78_v11 = vld [vmem:[%s532_s3 + $0x38] sm:$0xff]  ;;  %v77_v12 = vld [vmem:[%s532_s3 + $0x30] sm:$0xff]  ;;  %s258_s1 = sshll.u32 %s540_s11, 4  ;;  %s259_s1 = int_to_ptr.hbm [resolvable:$true] %s258_s1 }
   0x9   :  { %v76_v13 = vld [vmem:[%s532_s3 + $0x28] sm:$0xff]  ;;  %v75_v14 = vld [vmem:[%s532_s3 + $0x20] sm:$0xff]  ;;  %v74_v15 = vld [vmem:[%s532_s3 + $0x18] sm:$0xff]  ;;  %v223_v0 = vand.u32 127, %v222_v63 }
   0xa   :  { %95 = vmatpush.msra.mxu1 %v82_v7  ;;  %v73_v16 = vld [vmem:[%s532_s3 + $0x10] sm:$0xff]  ;;  %v72_v17 = vld [vmem:[%s532_s3 + $0x8] sm:$0xff]  ;;  %v71_v18 = vld [vmem:[%s532_s3] sm:$0xff] }
   0xb   :  { %v127_v19 = vld [vmem:[%s534_s5 + $0x78] sm:$0xff]  ;;  %v126_v20 = vld [vmem:[%s534_s5 + $0x70] sm:$0xff]  ;;  %v125_v21 = vld [vmem:[%s534_s5 + $0x68] sm:$0xff]  ;;  %vm224_vm3 = vcmp.lt.s32.totalorder %v223_v0, 5 }
   0xc   :  { %96 = vmatpush.msra.mxu1 %v81_v8  ;;  %132 = vmatpush.msra.mxu2 %v127_v19  ;;  %v124_v22 = vld [vmem:[%s534_s5 + $0x60] sm:$0xff]  ;;  %v123_v23 = vld [vmem:[%s534_s5 + $0x58] sm:$0xff]  ;;  %v122_v24 = vld [vmem:[%s534_s5 + $0x50] sm:$0xff] }
   0xd   :  { %v121_v25 = vld [vmem:[%s534_s5 + $0x48] sm:$0xff]  ;;  %v120_v26 = vld [vmem:[%s534_s5 + $0x40] sm:$0xff]  ;;  %v119_v27 = vld [vmem:[%s534_s5 + $0x38] sm:$0xff] }
   0xe   :  { %97 = vmatpush.msra.mxu1 %v80_v9  ;;  %133 = vmatpush.msra.mxu2 %v126_v20  ;;  %v118_v28 = vld [vmem:[%s534_s5 + $0x30] sm:$0xff]  ;;  %v117_v29 = vld [vmem:[%s534_s5 + $0x28] sm:$0xff]  ;;  %v116_v30 = vld [vmem:[%s534_s5 + $0x20] sm:$0xff] }
   0xf   :  { %v115_v31 = vld [vmem:[%s534_s5 + $0x18] sm:$0xff]  ;;  %v271_v32 = vld [vmem:[%s531_s2] ss:$0 sm:$0xff]  ;;  %v114_v36 = vld [vmem:[%s534_s5 + $0x10] sm:$0xff] }
  0x10   :  { %98 = vmatpush.msra.mxu1 %v79_v10  ;;  %134 = vmatpush.msra.mxu2 %v125_v21  ;;  %v113_v37 = vld [vmem:[%s534_s5 + $0x8] sm:$0xff]  ;;  %v112_v38 = vld [vmem:[%s534_s5] sm:$0xff]  ;;  %v160_v39 = vld [vmem:[%s536_s7 + $0x38] sm:$0xff] }
  0x11   :  { %v159_v40 = vld [vmem:[%s536_s7 + $0x30] sm:$0xff]  ;;  %177 = vmatpush.msra.mxu3 %v160_v39  ;;  %v158_v41 = vld [vmem:[%s536_s7 + $0x28] sm:$0xff]  ;;  %v157_v42 = vld [vmem:[%s536_s7 + $0x20] sm:$0xff] }
  0x12   :  { %99 = vmatpush.msra.mxu1 %v78_v11  ;;  %135 = vmatpush.msra.mxu2 %v124_v22  ;;  %v156_v43 = vld [vmem:[%s536_s7 + $0x18] sm:$0xff]  ;;  %v272_v44 = vld [vmem:[%s533_s4] ss:$0 sm:$0xff]  ;;  %v155_v48 = vld [vmem:[%s536_s7 + $0x10] sm:$0xff] }
  0x13   :  { %178 = vmatpush.msra.mxu3 %v159_v40  ;;  %v154_v49 = vld [vmem:[%s536_s7 + $0x8] sm:$0xff]  ;;  %v153_v50 = vld [vmem:[%s536_s7] sm:$0xff]  ;;  %v193_v51 = vld [vmem:[%s538_s9 + $0x18] sm:$0xff] }
  0x14   :  { %100 = vmatpush.msra.mxu1 %v77_v12  ;;  %136 = vmatpush.msra.mxu2 %v123_v23  ;;  %v192_v52 = vld [vmem:[%s538_s9 + $0x10] sm:$0xff]  ;;  %v273_v53 = vld [vmem:[%s535_s6] ss:$0 sm:$0xff]  ;;  %v191_v57 = vld [vmem:[%s538_s9 + $0x8] sm:$0xff] }
  0x15   :  { %179 = vmatpush.msra.mxu3 %v158_v41  ;;  %214 = vmatpush.msrb.mxu0 %v193_v51  ;;  %v190_v58 = vld [vmem:[%s538_s9] sm:$0xff] }
  0x16   :  { %101 = vmatpush.msra.mxu1 %v76_v13  ;;  %137 = vmatpush.msra.mxu2 %v122_v24  ;;  %v274_v59 = vld [vmem:[%s537_s8] ss:$0 sm:$0xff]  ;;  %s306_s8 = smov [#allocation2]  }
  0x17   :  { %180 = vmatpush.msra.mxu3 %v157_v42  ;;  %215 = vmatpush.msrb.mxu0 %v192_v52  ;;  %v275_v1 = vld [vmem:[%s539_s10] ss:$0 sm:$0xff]  ;;  %s256_s9 = sshll.u32 %s306_s8, 4  ;;  %s257_s9 = int_to_ptr.vmem [resolvable:$true] %s256_s9 }
  0x18   :  { %102 = vmatpush.msra.mxu1 %v75_v14  ;;  %138 = vmatpush.msra.mxu2 %v121_v25 }
  0x19   :  { %181 = vmatpush.msra.mxu3 %v156_v43  ;;  %216 = vmatpush.msrb.mxu0 %v191_v57 }
  0x1a   :  { %103 = vmatpush.msra.mxu1 %v74_v15  ;;  %139 = vmatpush.msra.mxu2 %v120_v26 }
  0x1b   :  { %182 = vmatpush.msra.mxu3 %v155_v48  ;;  %217 = vmatpush.msrb.mxu0 %v190_v58 }
  0x1c   :  { %104 = vmatpush.msra.mxu1 %v73_v16  ;;  %140 = vmatpush.msra.mxu2 %v119_v27 }
  0x1d   :  { %183 = vmatpush.msra.mxu3 %v154_v49 }
  0x1e   :  { %105 = vmatpush.msra.mxu1 %v72_v17  ;;  %141 = vmatpush.msra.mxu2 %v118_v28 }
  0x1f   :  { %184 = vmatpush.msra.mxu3 %v153_v50 }
  0x20   :  { %106 = vmatpush.msra.mxu1 %v71_v18  ;;  %142 = vmatpush.msra.mxu2 %v117_v29 }
  0x22   :  { %143 = vmatpush.msra.mxu2 %v116_v30 }
  0x24   :  { %144 = vmatpush.msra.mxu2 %v115_v31 }
  0x26   :  { %145 = vmatpush.msra.mxu2 %v114_v36 }
  0x28   :  { %146 = vmatpush.msra.mxu2 %v113_v37 }
  0x2a   :  { %147 = vmatpush.msra.mxu2 %v112_v38 }
  0x82   :  { %v67_v33 = vpop.f32.mrf.mxu0 }
  0x83   :  { %v68_v34 = vadd.f32 %v271_v32, %v67_v33 }
  0x85   :  { %v70_v35 = vmax.f32 %v68_v34, 0.0 }
  0x87   :  { %107 = vmatmul.f32.vlgmr.msra.gmra.mxu1 %v70_v35 }
 0x104   :  { %v108_v45 = vpop.f32.mrf.mxu1 }
 0x105   :  { %v109_v46 = vadd.f32 %v272_v44, %v108_v45 }
 0x107   :  { %v111_v47 = vmax.f32 %v109_v46, 0.0 }
 0x109   :  { %148 = vmatmul.f32.vlgmr.msra.gmra.mxu2 %v111_v47 }
 0x18c   :  { %v149_v54 = vpop.f32.mrf.mxu2 }
 0x18d   :  { %v150_v55 = vadd.f32 %v273_v53, %v149_v54 }
 0x18f   :  { %v152_v56 = vmax.f32 %v150_v55, 0.0 }
 0x191   :  { %268 = vmatmul.msk.f32.vlgmr.msra.gmra.mxu3 %vm165_vm1, %v152_v56 }
 0x214   :  { %v186_v60 = vpop.f32.mrf.mxu3 }
 0x215   :  { %v187_v61 = vadd.f32 %v274_v59, %v186_v60 }
 0x217   :  { %v189_v62 = vmax.f32 %v187_v61, 0.0 }
 0x219   :  { %269 = vmatmul.msk.f32.vlgmr.msrb.gmra.mxu0 %vm198_vm2, %v189_v62 }
 0x296   :  { %v219_v2 = vpop.f32.mrf.mxu0 }
 0x297   :  { %v220_v3 = vadd.f32 %v275_v1, %v219_v2 }
 0x299   :  { %v225_v4 = vsel %vm224_vm3, %v220_v3, -inf }
 0x29a   :  { %226 = vmax.xlane.f32.xlu0 %v225_v4 }
 0x30d   :  { %v227_v5 = vpop.xlane.xlu0 %226 }
 0x30e   :  { %v228_v6 = vsub.f32 %v220_v3, %v227_v5 }
 0x310   :  { %v229_v7 = vsel %vm224_vm3, %v228_v6, -inf }
 0x311   :  { %v230_v8 = vmul.f32 1.442695, %v229_v7 }
 0x313   :  { %276 = vpow2.f32 %v230_v8 }
 0x319   :  { %v277_v9 = vpop.eup %276 }
 0x31a   :  { %232 = vadd.xlane.f32.xlu0 %v277_v9 }
 0x38d   :  { %v233_v10 = vpop.xlane.xlu0 %232 }
 0x38e   :  { %278 = vrcp.f32 %v233_v10  ;;  %v245_v14 = vand.u32 2147483648, %v233_v10  ;;  %v243_v16 = vand.u32 2147483647, %v233_v10  ;;  %vm239_vm5 = vweird.f32 %v233_v10 }
 0x390   :  { %v246_v18 = vor.u32 1.1754944e-38, %v245_v14  ;;  %vm244_vm7 = vcmp.eq.f32.partialorder %v243_v16, 8.507059e+37 }
 0x394   :  { %v279_v11 = vpop.eup %278 }
 0x395   :  { %v235_v12 = vmul.f32 %v279_v11, %v233_v10  ;;  %vm240_vm4 = vweird.f32 %v279_v11 }
 0x396   :  { %vm241_vm6 = vmor %vm239_vm5, %vm240_vm4 }
 0x397   :  { %v236_v13 = vsub.f32 1.0, %v235_v12 }
 0x399   :  { %v237_v15 = vmul.f32 %v279_v11, %v236_v13 }
 0x39b   :  { %v238_v17 = vadd.f32 %v279_v11, %v237_v15 }
 0x39d   :  { %v242_v19 = vsel %vm241_vm6, %v279_v11, %v238_v17 }
 0x39e   :  { %v247_v20 = vsel %vm244_vm7, %v246_v18, %v242_v19 }
 0x39f   :  { %v248_v21 = vmul.f32 %v277_v9, %v247_v20 }
 0x3a1   :  { %v249_v22 = vsel %vm224_vm3, %v248_v21, %v220_v3 }
 0x3a2   :  { %250 = vst [vmem:[#allocation2] sm:$0xff] %v249_v22 }
 0x3a3   :  { %261 = dma.vmem_to_hbm [thread:$0]  %s257_s9, 128, %s259_s1, [#allocation3]  }
 0x3a4   :  { %304 = dma.done.wait [#allocation3], 128  }
 0x3a5   :  { %305 = vsyncadd [#allocation3], 4294967168 }
 0x3a6   :  { %266 = vsyncpa [#allocation3], 1 }

</bundles_post_ra>
